<compile_context>
chip_gen: v5e
topology: v5e:2x2
jax: 0.10.0
libtpu: 0.0.40
codegen_flags: <defaults>
</compile_context>

<pallas_src>
import functools

import jax
import jax.numpy as jnp
from jax.experimental import pallas as pl
from jax.experimental.pallas import tpu as pltpu


# ---------------------------------------------------------------------------
# Elementwise helpers (all math in f32 regardless of input dtype).
# ---------------------------------------------------------------------------
def _clamped_pow_f32(x, eps, p_f32, static_p):
    """clamp(x, eps) ** p in float32.

    static_p: Python int (>=1) -> exponentiation by repeated VPU multiplies.
              None             -> general exp(p * log(x)) path (EUP).
    """
    x = jnp.maximum(x.astype(jnp.float32), jnp.float32(eps))
    if static_p is not None:
        n = int(static_p)
        result = None
        base = x
        while True:
            if n & 1:
                result = base if result is None else result * base
            n >>= 1
            if n == 0:
                break
            base = base * base
        return result
    return jnp.exp(p_f32 * jnp.log(x))


def _root_f32(m, inv_p_f32, static_p):
    """m ** (1/p) for strictly positive m (tiny per-row epilogue)."""
    if static_p == 1:
        return m
    if static_p == 2:
        return jnp.sqrt(m)
    return jnp.exp(jnp.log(m) * inv_p_f32)


# ---------------------------------------------------------------------------
# Kernels.
# ---------------------------------------------------------------------------
def _gem_rows_kernel(p_ref, x_ref, o_ref, *, eps, inv_hw, static_p):
    # x_ref: (tm, hw)  ->  o_ref: (tm, 1); full spatial reduction per row.
    p = p_ref[0].astype(jnp.float32)
    inv_p = jnp.float32(1.0 / static_p) if static_p is not None else jnp.float32(1.0) / p
    xp = _clamped_pow_f32(x_ref[...], eps, p, static_p)
    m = jnp.sum(xp, axis=-1, keepdims=True) * jnp.float32(inv_hw)
    o_ref[...] = _root_f32(m, inv_p, static_p).astype(o_ref.dtype)


def _gem_packed_kernel(p_ref, seg_ref, x_ref, o_ref, *, eps, inv_hw, static_p):
    # x_ref: (tm, G*hw) lane-dense, seg_ref: (G*hw, G) one-hot segment matrix,
    # o_ref: (tm, G). Segmented reduction runs on the otherwise-idle MXU.
    p = p_ref[0].astype(jnp.float32)
    inv_p = jnp.float32(1.0 / static_p) if static_p is not None else jnp.float32(1.0) / p
    xp = _clamped_pow_f32(x_ref[...], eps, p, static_p)
    s = jnp.dot(xp, seg_ref[...], preferred_element_type=jnp.float32)
    m = s * jnp.float32(inv_hw)
    o_ref[...] = _root_f32(m, inv_p, static_p).astype(o_ref.dtype)


def _gem_hwtiled_kernel(p_ref, x_ref, o_ref, acc_ref, *, eps, hw, tk, inv_hw,
                        static_p):
    # 2-D grid (rows, hw-chunks): f32 partial-sum scratch, init at k==0,
    # finalize at the last k. Ragged hw columns are masked to 0.
    k = pl.program_id(1)

    @pl.when(k == 0)
    def _():
        acc_ref[...] = jnp.zeros_like(acc_ref)

    p = p_ref[0].astype(jnp.float32)
    xp = _clamped_pow_f32(x_ref[...], eps, p, static_p)
    col = k * tk + jax.lax.broadcasted_iota(jnp.int32, xp.shape, 1)
    xp = jnp.where(col < hw, xp, jnp.float32(0.0))
    acc_ref[...] += jnp.sum(xp, axis=-1, keepdims=True)

    @pl.when(k == pl.num_programs(1) - 1)
    def _():
        inv_p = (jnp.float32(1.0 / static_p) if static_p is not None
                 else jnp.float32(1.0) / p)
        m = acc_ref[...] * jnp.float32(inv_hw)
        o_ref[...] = _root_f32(m, inv_p, static_p).astype(o_ref.dtype)


# ---------------------------------------------------------------------------
# Wrapper.
# ---------------------------------------------------------------------------
def _tpu_generation():
    try:
        kind = jax.devices()[0].device_kind.lower()
    except Exception:
        return None
    if "v7" in kind or "7x" in kind:
        return 7
    for g in (6, 5, 4, 3):
        if f"v{g}" in kind:
            return g
    return None


def _pick_pack_factor(rows, hw):
    """Rows packed per lane-row; only pack when hw wastes lane density."""
    if hw % 128 == 0 or hw >= 1024:
        return 1
    # Keep >= 8 packed rows per tile row-axis and bound the segment matrix.
    max_g = max(1, min(rows // 8, 128, 4096 // hw))
    g = 1
    for cand in range(1, max_g + 1):
        if rows % cand == 0:
            g = cand
    return g


def gem_pallas(x, p, eps=1e-6, *, hw_block_elems=None):
    """GeM pooling: x (N, C, H, W) -> (N, C, 1, 1)."""
    N, C, H, W = x.shape
    rows, hw = N * C, H * W
    itemsize = jnp.dtype(x.dtype).itemsize

    # ----- static specialization of p (inference / frozen parameter) --------
    static_p = None
    try:
        pv = float(jnp.asarray(p).reshape(-1)[0])
        if abs(pv - round(pv)) < 1e-6 and 1 <= int(round(pv)) <= 16:
            static_p = int(round(pv))
    except Exception:  # p is a tracer (e.g. trainable under jit): general path
        static_p = None
    p_arr = jnp.asarray(p, dtype=jnp.float32).reshape((1,))

    # ----- chip-gated tile / VMEM budgets ------------------------------------
    gen = _tpu_generation()
    if gen is not None and gen >= 7:          # v7x: 64 MiB VMEM per TensorCore
        max_tile_bytes = 8 * 1024 * 1024
        vmem_limit = 48 * 1024 * 1024
        row_sem = pltpu.CORE_PARALLEL         # engage both TensorCores
    elif gen in (5, 6):                       # v5e / v6e: 128 MiB physical VMEM
        max_tile_bytes = 16 * 1024 * 1024
        vmem_limit = 96 * 1024 * 1024
        row_sem = pltpu.PARALLEL
    else:                                     # unknown chip: conservative
        max_tile_bytes = 8 * 1024 * 1024
        vmem_limit = 32 * 1024 * 1024
        row_sem = pltpu.PARALLEL

    sub = max(8, 8 * (4 // itemsize))         # sublane packing for the dtype
    bytes_per_elem = max(4, itemsize)         # f32 intermediates dominate

    def _row_tile(width, row_count):
        wpad = pl.cdiv(width, 128) * 128      # lane-padded footprint
        tm = max_tile_bytes // (wpad * bytes_per_elem)
        tm = max(sub, (tm // sub) * sub)
        tm = min(tm, 2048)
        if row_count <= tm:
            return row_count                  # single full-extent block
        return tm

    x2 = x.reshape(rows, hw)                  # zero-copy; no jnp.pad anywhere

    p_spec = pl.BlockSpec(memory_space=pltpu.MemorySpace.SMEM)
    cost = pl.CostEstimate(
        flops=6 * rows * hw,
        transcendentals=(2 * rows if static_p is not None
                         else 2 * rows * hw + 2 * rows),
        bytes_accessed=rows * hw * itemsize + rows * itemsize,
    )

    wpad_hw = pl.cdiv(hw, 128) * 128
    need_hw_tiling = (hw_block_elems is not None) or (
        sub * wpad_hw * bytes_per_elem > max_tile_bytes)

    if not need_hw_tiling:
        # ------------------- path A: one block spans the full H*W ------------
        g = _pick_pack_factor(rows, hw)
        rows2 = rows // g
        width = g * hw
        x3 = x2.reshape(rows2, width) if g > 1 else x2
        tm = _row_tile(width, rows2)
        grid = (pl.cdiv(rows2, tm),)          # ragged last block: OOB writes dropped
        cparams = pltpu.CompilerParams(
            dimension_semantics=(row_sem,), vmem_limit_bytes=vmem_limit)

        if g == 1:
            kernel = functools.partial(
                _gem_rows_kernel, eps=float(eps), inv_hw=1.0 / hw, static_p=static_p)
            out = pl.pallas_call(
                kernel,
                out_shape=jax.ShapeDtypeStruct((rows2, 1), x.dtype),
                grid=grid,
                in_specs=[p_spec,
                          pl.BlockSpec((tm, width), lambda i: (i, 0))],
                out_specs=pl.BlockSpec((tm, 1), lambda i: (i, 0)),
                compiler_params=cparams,
                cost_estimate=cost,
            )(p_arr, x3)
        else:
            # One-hot segment matrix (G*hw, G); constant block index -> DMA'd once.
            seg = (jnp.arange(width, dtype=jnp.int32)[:, None] // hw
                   == jnp.arange(g, dtype=jnp.int32)[None, :]).astype(jnp.float32)
            kernel = functools.partial(
                _gem_packed_kernel, eps=float(eps), inv_hw=1.0 / hw, static_p=static_p)
            out = pl.pallas_call(
                kernel,
                out_shape=jax.ShapeDtypeStruct((rows2, g), x.dtype),
                grid=grid,
                in_specs=[p_spec,
                          pl.BlockSpec((width, g), lambda i: (0, 0)),
                          pl.BlockSpec((tm, width), lambda i: (i, 0))],
                out_specs=pl.BlockSpec((tm, g), lambda i: (i, 0)),
                compiler_params=cparams,
                cost_estimate=cost,
            )(p_arr, seg, x3)
        return out.reshape(N, C, 1, 1)

    # ----------------- path B: reduction grid axis over H*W ------------------
    if hw_block_elems is not None:
        tk = max(128, (int(hw_block_elems) // 128) * 128)
    else:
        tk = 32 * 1024
    tk = min(tk, (hw // 128) * 128) if hw >= 128 else hw
    if tk <= 0:
        tk = hw
    tm = _row_tile(tk, rows)
    grid = (pl.cdiv(rows, tm), pl.cdiv(hw, tk))
    kernel = functools.partial(
        _gem_hwtiled_kernel, eps=float(eps), hw=hw, tk=tk,
        inv_hw=1.0 / hw, static_p=static_p)
    out = pl.pallas_call(
        kernel,
        out_shape=jax.ShapeDtypeStruct((rows, 1), x.dtype),
        grid=grid,
        in_specs=[p_spec,
                  pl.BlockSpec((tm, tk), lambda i, k: (i, k))],
        out_specs=pl.BlockSpec((tm, 1), lambda i, k: (i, 0)),
        scratch_shapes=[pltpu.VMEM((tm, 1), jnp.float32)],
        compiler_params=pltpu.CompilerParams(
            dimension_semantics=(row_sem, pltpu.ARBITRARY),
            vmem_limit_bytes=vmem_limit),
        cost_estimate=cost,
    )(p_arr, x2)
    return out.reshape(N, C, 1, 1)


# ---------------------------------------------------------------------------
# Self-test.
# ---------------------------------------------------------------------------
if __name__ == "__main__":
    key = jax.random.PRNGKey(0)

    def reference(x, p, eps):
        pv = jnp.asarray(p, jnp.float32).reshape(-1)[0]
        xf = x.astype(jnp.float32)
        m = jnp.mean(jnp.maximum(xf, eps) ** pv, axis=(-2, -1), keepdims=True)
        return (m ** (1.0 / pv)).astype(x.dtype)

    def check(x, p, eps=1e-6, *, rtol, atol, **kw):
        out = gem_pallas(x, p, eps, **kw)
        jax.block_until_ready(out)
        ref = reference(x, p, eps)
        assert out.shape == (x.shape[0], x.shape[1], 1, 1), out.shape
        o32, r32 = out.astype(jnp.float32), ref.astype(jnp.float32)
        assert jnp.allclose(o32, r32, rtol=rtol, atol=atol), float(
            jnp.max(jnp.abs(o32 - r32)))

    p3 = jnp.ones((1,), jnp.float32) * 3.0   # matches nn.Parameter(ones(1) * 3)
    k0, k1, k2, k3 = jax.random.split(key, 4)

    # 1) Spec shape: static integer p=3 (VPU multiplies), lane-dense hw=256.
    x = jax.random.normal(k0, (2, 4, 16, 16), jnp.float32)
    check(x, p3, rtol=1e-4, atol=1e-6)

    # 2) 7x7 feature map: packed lane-dense path + MXU segmented reduction.
    x = jax.random.normal(k1, (4, 16, 7, 7), jnp.float32)
    check(x, p3, rtol=1e-4, atol=1e-6)

    # 3) Non-integer p: general exp/log path, p read from SMEM.
    x = jax.random.normal(k2, (2, 4, 16, 16), jnp.float32)
    check(x, jnp.asarray([2.5], jnp.float32), rtol=1e-4, atol=1e-6)

    # 4) Forced H*W reduction grid (accumulator scratch + ragged-column mask).
    x = jax.random.normal(k3, (2, 4, 16, 10), jnp.float32)
    check(x, p3, rtol=1e-4, atol=1e-6, hw_block_elems=128)

    # 5) bf16 input (compute stays f32; output cast back to bf16).
    xb = jax.random.normal(k0, (2, 4, 16, 16), jnp.float32).astype(jnp.bfloat16)
    check(xb, p3, rtol=2e-2, atol=2e-2)

    print("KERNEL_OK")
</pallas_src>

<mosaic_0001>
module attributes {stable_mosaic.version = 11 : i64} {
  func.func @_gem_rows_kernel(%arg0: i32, %arg1: memref<1xf32, #tpu.memory_space<smem>>, %arg2: memref<8x256xf32, #tpu.memory_space<vmem>>, %arg3: memref<8x1xf32, #tpu.memory_space<vmem>>) attributes {dimension_semantics = [#tpu.dimension_semantics<parallel>], iteration_bounds = array<i64: 1>, scalar_prefetch = 0 : i64, scratch_operands = 0 : i64, tpu.core_type = #tpu.core_type<tc>, window_params = [{transform_indices = @transform_0, window_bounds = array<i64: 1>}, {transform_indices = @transform_1, window_bounds = array<i64: 8, 256>}, {transform_indices = @transform_2, window_bounds = array<i64: 8, 1>}]} {
    %c0 = arith.constant 0 : index
    %c0_0 = arith.constant 0 : index
    %0 = vector.load %arg2[%c0, %c0_0] : memref<8x256xf32, #tpu.memory_space<vmem>>, vector<8x256xf32>
    %cst = arith.constant 9.99999997E-7 : f32
    %1 = vector.broadcast %cst : f32 to vector<8x256xf32>
    %2 = arith.maximumf %0, %1 : vector<8x256xf32>
    %3 = arith.mulf %2, %2 : vector<8x256xf32>
    %4 = arith.mulf %2, %3 : vector<8x256xf32>
    %cst_1 = arith.constant dense<0.000000e+00> : vector<8xf32>
    %5 = vector.multi_reduction <add>, %4, %cst_1 [1] : vector<8x256xf32> to vector<8xf32>
    %6 = vector.shape_cast %5 : vector<8xf32> to vector<8x1xf32>
    %cst_2 = arith.constant 3.906250e-03 : f32
    %7 = vector.broadcast %cst_2 : f32 to vector<8x1xf32>
    %8 = arith.mulf %6, %7 : vector<8x1xf32>
    %9 = math.log %8 : vector<8x1xf32>
    %cst_3 = arith.constant 0.333333343 : f32
    %10 = vector.broadcast %cst_3 : f32 to vector<8x1xf32>
    %11 = arith.mulf %9, %10 : vector<8x1xf32>
    %12 = math.exp %11 : vector<8x1xf32>
    %c0_4 = arith.constant 0 : index
    %c0_5 = arith.constant 0 : index
    %13 = vector.load %arg3[%c0_4, %c0_5] : memref<8x1xf32, #tpu.memory_space<vmem>>, vector<8x1xf32>
    tpu.vector_store %arg3[%c0_4, %c0_5], %12 {strides = array<i32>} : memref<8x1xf32, #tpu.memory_space<vmem>>, vector<8x1xf32>,
    return
  }
  func.func @transform_0(%arg0: i32) -> i32 {
    %c0_i32 = arith.constant 0 : i32
    %c0_i32_0 = arith.constant 0 : i32
    return %c0_i32 : i32
  }
  func.func @transform_1(%arg0: i32) -> (i32, i32) {
    %c0_i32 = arith.constant 0 : i32
    %c0_i32_0 = arith.constant 0 : i32
    return %arg0, %c0_i32 : i32, i32
  }
  func.func @transform_2(%arg0: i32) -> (i32, i32) {
    %c0_i32 = arith.constant 0 : i32
    %c0_i32_0 = arith.constant 0 : i32
    return %arg0, %c0_i32 : i32, i32
  }
}

</mosaic_0001>

<bundles_post_ra>
// kernel: tpu_custom_call.1
= control target key start
LH: loop header
LB: loop body
LE: loop exit
PB: predicated region body
PF: predicated region fallthrough
CT: control target
= control target key end

     0   :  { %8 = vsyncpa [#allocation4], 0  ;;  %s81_s12 = smov [#allocation3]   ;;  %s103_s0 = inlined_call_operand.<no memory space> [shape: f32[1], index: 0, kind: input, shape index: {}]   ;;  %s104_s1 = inlined_call_operand.hbm [shape: f32[8,256], index: 1, kind: input, shape index: {}]   ;;  %s105_s2 = inlined_call_operand.vmem [shape: f32[8,1], index: 2, kind: output, shape index: {}]  }
   0x1   :  { %s16_s11 = sshll.u32 %s104_s1, 4  ;;  %s18_s13 = sshll.u32 %s81_s12, 4  ;;  %s17_s11 = int_to_ptr.hbm [resolvable:$true] %s16_s11  ;;  %s19_s13 = int_to_ptr.vmem [resolvable:$true] %s18_s13 }
   0x2   :  { %21 = dma.hbm_to_vmem [thread:$0]  %s17_s11, 256, %s19_s13, [#allocation4]  }
   0x3   :  { %79 = dma.done.wait [#allocation4], 256  }
   0x4   :  { %80 = vsyncadd [#allocation4], 4294967040  ;;  %v26_v0 = vld [vmem:[#allocation3] sm:$0xff]  ;;  %v27_v1 = vld [vmem:[#allocation3 + $0x8] sm:$0xff]  ;;  %vm43_vm0 = vcmask 7168  }
   0x5   :  { %v28_v2 = vmax.f32 %v26_v0, 1e-06  ;;  %v29_v3 = vmax.f32 %v27_v1, 1e-06 }
   0x7   :  { %v30_v4 = vmul.f32 %v28_v2, %v28_v2  ;;  %v31_v5 = vmul.f32 %v29_v3, %v29_v3 }
   0x9   :  { %v32_v6 = vmul.f32 %v30_v4, %v28_v2  ;;  %v33_v7 = vmul.f32 %v31_v5, %v29_v3 }
   0xb   :  { %v34_v8 = vadd.f32 %v33_v7, %v32_v6 }
   0xd   :  { %35 = vadd.xlane.f32.xlu0 %v34_v8 }
  0x80   :  { %v36_v9 = vpop.xlane.xlu0 %35 }
  0x81   :  { %v37_v10 = vmul.f32 0.00390625, %v36_v9 }
  0x83   :  { %51 = vlog2.f32 %v37_v10 }
  0x89   :  { %v52_v11 = vpop.eup %51 }
  0x8a   :  { %v39_v12 = vmul.f32 0.6931472, %v52_v11 }
  0x8c   :  { %v40_v13 = vmul.f32 0.33333334, %v39_v12 }
  0x8e   :  { %v41_v14 = vmul.f32 1.442695, %v40_v13 }
  0x90   :  { %53 = vpow2.f32 %v41_v14 }
  0x96   :  { %v54_v15 = vpop.eup %53 }
  0x97   :  { %44 = vst.msk [vmem:[%s105_s2] sm:$0xff] %vm43_vm0, %v54_v15 }
  0x98   :  { %49 = vsyncpa [#allocation4], 1 }

</bundles_post_ra>
